<compile_context>
chip_gen: v5e
topology: v5e:2x2
jax: 0.10.0
libtpu: 0.0.40
codegen_flags: <defaults>
</compile_context>

<pallas_src>
import functools

import jax
import jax.numpy as jnp
from jax.experimental import pallas as pl
from jax.experimental.pallas import tpu as pltpu


def _norm_kernel(x_ref, alpha_ref, bias_ref, o_ref, *, eps, d_model):
    x = x_ref[...].astype(jnp.float32)                            # (R, D)
    mean = jnp.mean(x, axis=-1, keepdims=True)                    # (R, 1)
    num = x - mean
    # Unbiased variance (Bessel correction, /(D-1)) to match torch.Tensor.std().
    var = jnp.sum(num * num, axis=-1, keepdims=True) * jnp.float32(1.0 / (d_model - 1))
    denom = jnp.sqrt(var) + jnp.float32(eps)                      # eps added to std
    # Column-wise exact reciprocal: EUP work is (R,1) instead of a broadcast
    # divide over the full (R,D) tile; the hot elementwise path is pure VALU.
    inv = pl.reciprocal(denom, approx=False)                      # (R, 1)
    out = (num * inv) * alpha_ref[...] + bias_ref[...]            # (R, D)
    o_ref[...] = out.astype(o_ref.dtype)


def _round_up(x, m):
    return (x + m - 1) // m * m


def _choose_tile_rows(n_rows, d_model, itemsize, requested=None):
    """Pick a row-tile: big enough to hit HBM roofline, small enough for VMEM."""
    # sublane packing: 8 rows per vreg for 32-bit, 16 for 16-bit, 32 for 8-bit
    pack = 8 if itemsize >= 4 else (16 if itemsize == 2 else 32)
    if requested is not None:
        tile = max(pack, _round_up(requested, pack))
    else:
        # ~12 MiB budget for double-buffered input + output tiles (HBM dtype);
        # f32 compute temporaries fit inside the 32 MiB scoped-VMEM limit.
        budget = 12 * 1024 * 1024
        per_row = 4 * d_model * itemsize                 # 2 in bufs + 2 out bufs
        tile = max(pack, min(1024, budget // max(per_row, 1)))
        tile = (tile // pack) * pack
    # never larger than the (padded) row count
    tile = min(tile, _round_up(n_rows, pack))
    # keep the grid length >= 2 so both v7x TensorCores get work
    while tile > pack and pl.cdiv(n_rows, tile) < 2:
        tile = max(pack, ((tile // 2) // pack) * pack)
    return tile


def norm(x, alpha, bias, eps=1e-6, tile_rows=None):
    """LayerNorm-style Norm over the last axis (Pallas TPU kernel)."""
    orig_shape = x.shape
    d_model = orig_shape[-1]
    assert d_model > 1, "d_model must be > 1 (unbiased std divides by D-1)"

    x2 = x.reshape(-1, d_model)
    n_rows = x2.shape[0]

    tile = _choose_tile_rows(n_rows, d_model, x2.dtype.itemsize, tile_rows)
    n_padded = _round_up(n_rows, tile)
    if n_padded != n_rows:
        # zero rows -> mean 0, std 0, denom = eps (finite); results are sliced off
        x2 = jnp.pad(x2, ((0, n_padded - n_rows), (0, 0)))

    # Pass params already in f32 so no per-iteration cast happens in the kernel.
    alpha2 = alpha.reshape(1, d_model).astype(jnp.float32)
    bias2 = bias.reshape(1, d_model).astype(jnp.float32)

    kernel = functools.partial(_norm_kernel, eps=eps, d_model=d_model)

    out = pl.pallas_call(
        kernel,
        out_shape=jax.ShapeDtypeStruct((n_padded, d_model), x.dtype),
        grid_spec=pltpu.PrefetchScalarGridSpec(
            num_scalar_prefetch=0,
            grid=(n_padded // tile,),
            in_specs=[
                pl.BlockSpec((tile, d_model), lambda i: (i, 0)),
                pl.BlockSpec((1, d_model), lambda i: (0, 0)),   # alpha: resident
                pl.BlockSpec((1, d_model), lambda i: (0, 0)),   # bias:  resident
            ],
            out_specs=pl.BlockSpec((tile, d_model), lambda i: (i, 0)),
        ),
        compiler_params=pltpu.CompilerParams(
            dimension_semantics=("parallel",),
            vmem_limit_bytes=32 * 1024 * 1024,
        ),
    )(x2, alpha2, bias2)

    if n_padded != n_rows:
        out = out[:n_rows]
    return out.reshape(orig_shape)


if __name__ == "__main__":
    # Small shapes consistent with the module: arbitrary leading dims, last = d_model.
    batch, seq, d_model = 2, 8, 32
    key = jax.random.PRNGKey(0)
    x = jax.random.normal(key, (batch, seq, d_model), dtype=jnp.float32)

    # Deterministic parameter init matching nn.Parameter(ones) / (zeros).
    alpha = jnp.ones((d_model,), dtype=jnp.float32)
    bias = jnp.zeros((d_model,), dtype=jnp.float32)

    out = norm(x, alpha, bias, eps=1e-6)
    out = jax.block_until_ready(out)

    # Reference in plain JAX (unbiased std + eps added to std).
    mean = jnp.mean(x, axis=-1, keepdims=True)
    std = jnp.sqrt(jnp.sum((x - mean) ** 2, axis=-1, keepdims=True) / (d_model - 1))
    ref = alpha * ((x - mean) / (std + 1e-6)) + bias
    assert jnp.allclose(out, ref, atol=1e-5, rtol=1e-5), "mismatch vs reference"

    # Also exercise the padded / non-divisible path once.
    x_odd = jax.random.normal(jax.random.PRNGKey(1), (3, 7, d_model), dtype=jnp.float32)
    out_odd = jax.block_until_ready(norm(x_odd, alpha, bias, eps=1e-6))
    mean_o = jnp.mean(x_odd, axis=-1, keepdims=True)
    std_o = jnp.sqrt(jnp.sum((x_odd - mean_o) ** 2, axis=-1, keepdims=True) / (d_model - 1))
    ref_o = alpha * ((x_odd - mean_o) / (std_o + 1e-6)) + bias
    assert jnp.allclose(out_odd, ref_o, atol=1e-5, rtol=1e-5), "mismatch (padded path)"

    print("KERNEL_OK")
</pallas_src>

<mosaic_0001>
module attributes {stable_mosaic.version = 11 : i64} {
  func.func @_norm_kernel(%arg0: i32, %arg1: memref<8x32xf32, #tpu.memory_space<vmem>>, %arg2: memref<1x32xf32, #tpu.memory_space<vmem>>, %arg3: memref<1x32xf32, #tpu.memory_space<vmem>>, %arg4: memref<8x32xf32, #tpu.memory_space<vmem>>) attributes {dimension_semantics = [#tpu.dimension_semantics<parallel>], iteration_bounds = array<i64: 2>, scalar_prefetch = 0 : i64, scratch_operands = 0 : i64, tpu.core_type = #tpu.core_type<tc>, window_params = [{transform_indices = @transform_0, window_bounds = array<i64: 8, 32>}, {pipeline_mode = #tpu.pipeline_mode<synchronous>, transform_indices = @transform_1, window_bounds = array<i64: 1, 32>}, {pipeline_mode = #tpu.pipeline_mode<synchronous>, transform_indices = @transform_2, window_bounds = array<i64: 1, 32>}, {transform_indices = @transform_3, window_bounds = array<i64: 8, 32>}]} {
    %c0 = arith.constant 0 : index
    %c0_0 = arith.constant 0 : index
    %0 = vector.load %arg1[%c0, %c0_0] : memref<8x32xf32, #tpu.memory_space<vmem>>, vector<8x32xf32>
    %cst = arith.constant dense<0.000000e+00> : vector<8xf32>
    %1 = vector.multi_reduction <add>, %0, %cst [1] : vector<8x32xf32> to vector<8xf32>
    %2 = vector.shape_cast %1 : vector<8xf32> to vector<8x1xf32>
    %cst_1 = arith.constant 3.200000e+01 : f32
    %3 = vector.broadcast %cst_1 : f32 to vector<8x1xf32>
    %4 = arith.divf %2, %3 : vector<8x1xf32>
    %5 = vector.broadcast %4 : vector<8x1xf32> to vector<8x32xf32>
    %6 = arith.subf %0, %5 : vector<8x32xf32>
    %7 = arith.mulf %6, %6 : vector<8x32xf32>
    %cst_2 = arith.constant dense<0.000000e+00> : vector<8xf32>
    %8 = vector.multi_reduction <add>, %7, %cst_2 [1] : vector<8x32xf32> to vector<8xf32>
    %9 = vector.shape_cast %8 : vector<8xf32> to vector<8x1xf32>
    %cst_3 = arith.constant 0.0322580636 : f32
    %10 = vector.broadcast %cst_3 : f32 to vector<8x1xf32>
    %11 = arith.mulf %9, %10 : vector<8x1xf32>
    %12 = math.sqrt %11 : vector<8x1xf32>
    %cst_4 = arith.constant 9.99999997E-7 : f32
    %13 = vector.broadcast %cst_4 : f32 to vector<8x1xf32>
    %14 = arith.addf %12, %13 : vector<8x1xf32>
    %15 = tpu.reciprocal %14 : vector<8x1xf32> -> vector<8x1xf32>
    %16 = vector.broadcast %15 : vector<8x1xf32> to vector<8x32xf32>
    %17 = arith.mulf %6, %16 : vector<8x32xf32>
    %c0_5 = arith.constant 0 : index
    %c0_6 = arith.constant 0 : index
    %18 = vector.load %arg2[%c0_5, %c0_6] : memref<1x32xf32, #tpu.memory_space<vmem>>, vector<1x32xf32>
    %19 = vector.broadcast %18 : vector<1x32xf32> to vector<8x32xf32>
    %20 = arith.mulf %17, %19 : vector<8x32xf32>
    %c0_7 = arith.constant 0 : index
    %c0_8 = arith.constant 0 : index
    %21 = vector.load %arg3[%c0_7, %c0_8] : memref<1x32xf32, #tpu.memory_space<vmem>>, vector<1x32xf32>
    %22 = vector.broadcast %21 : vector<1x32xf32> to vector<8x32xf32>
    %23 = arith.addf %20, %22 : vector<8x32xf32>
    %c0_9 = arith.constant 0 : index
    %c0_10 = arith.constant 0 : index
    %24 = vector.load %arg4[%c0_9, %c0_10] : memref<8x32xf32, #tpu.memory_space<vmem>>, vector<8x32xf32>
    tpu.vector_store %arg4[%c0_9, %c0_10], %23 {strides = array<i32>} : memref<8x32xf32, #tpu.memory_space<vmem>>, vector<8x32xf32>,
    return
  }
  func.func @transform_0(%arg0: i32) -> (i32, i32) {
    %c0_i32 = arith.constant 0 : i32
    %c0_i32_0 = arith.constant 0 : i32
    return %arg0, %c0_i32 : i32, i32
  }
  func.func @transform_1(%arg0: i32) -> (i32, i32) {
    %c0_i32 = arith.constant 0 : i32
    %c0_i32_0 = arith.constant 0 : i32
    %c0_i32_1 = arith.constant 0 : i32
    return %c0_i32, %c0_i32_0 : i32, i32
  }
  func.func @transform_2(%arg0: i32) -> (i32, i32) {
    %c0_i32 = arith.constant 0 : i32
    %c0_i32_0 = arith.constant 0 : i32
    %c0_i32_1 = arith.constant 0 : i32
    return %c0_i32, %c0_i32_0 : i32, i32
  }
  func.func @transform_3(%arg0: i32) -> (i32, i32) {
    %c0_i32 = arith.constant 0 : i32
    %c0_i32_0 = arith.constant 0 : i32
    return %arg0, %c0_i32 : i32, i32
  }
}

</mosaic_0001>

<bundles_post_ra>
// kernel: tpu_custom_call.1
= control target key start
LH: loop header
LB: loop body
LE: loop exit
PB: predicated region body
PF: predicated region fallthrough
CT: control target
= control target key end

     0   :  { %8 = vsyncpa [#allocation3], 0  ;;  %s739_s0 = inlined_call_operand.hbm [shape: f32[16,32], index: 0, kind: input, shape index: {}]   ;;  %s740_s1 = inlined_call_operand.hbm [shape: f32[1,32], index: 1, kind: input, shape index: {}]   ;;  %s741_s2 = inlined_call_operand.vmem [shape: f32[1,32], index: 2, kind: input, shape index: {}]   ;;  %s742_s3 = inlined_call_operand.hbm [shape: f32[16,32], index: 3, kind: output, shape index: {}]  }
   0x1   :  { %10 = vsyncpa [#allocation3 + $0x1], 0 }
   0x2   :  { %11 = vsyncpa [#allocation6], 0 }
   0x3   :  { %12 = vsyncpa [#allocation4], 0 }
   0x4   :  { %14 = vsyncpa [#allocation4 + $0x1], 0  ;;  %s591_s12 = smov 0   ;;  %s593_s13 = smov 0  }
   0x5   :  { %s595_s14 = smov 0   ;;  %s597_s15 = smov 0  }
   0x6 LB: > { %s612_s16 = sadd.s32 4294967295, %s567_s15   ;;  %s357_s17 = sadd.s32 4294967294, %s567_s15   ;;  %s567_s15 = sphi %s597_s15, %s752_s15   ;;  %s563_s14 = sphi %s595_s14, %s751_s14   ;;  %s559_s13 = sphi %s593_s13, %s750_s13   ;;  %s555_s12 = sphi %s591_s12, %s749_s12  }
   0x7   : > { %p40_p0 = scmp.ne.s32.totalorder %s559_s13, %s555_s12  ;;  %p41_p1 = scmp.eq.s32.totalorder %s612_s16, 0 }
   0x8   : > { %p106_p2 = scmp.eq.s32.totalorder %s612_s16, 1  ;;  %p112_p3 = scmp.eq.s32.totalorder %s357_s17, 1 }
   0x9   : > { %p621_p4 = por %p41_p1, %p40_p0  ;;  %p358_p5 = scmp.ge.s32.totalorder %s567_s15, 1 }
   0xa   : > { %p626_p6 = por %p112_p3, %p40_p0  ;;  %p119_p7 = scmp.lt.s32.totalorder %s567_s15, 3 }
   0xb   : > { %s131_s22 = sshll.u32 %s740_s1, 4  ;;  %s569_s24 = smov [#allocation5]   ;;  %s132_s22 = int_to_ptr.hbm [resolvable:$true] %s131_s22 }
   0xc   : > { %p634_p8 = pnand %p358_p5, %p119_p7  ;;  %s133_s25 = sshll.u32 %s569_s24, 4  ;;  %s134_s25 = int_to_ptr.vmem [resolvable:$true] %s133_s25 }
   0xd   : > { %s644_s26 = sadd.s32 1, %s567_s15   ;;  %s27_s27 = sadd.s32 1, %s563_s14 }
   0xe   : > { %p379_p10 = pneg %p634_p8  ;;  %s24_s28 = ssub.s32 %s567_s15, %s644_s26 }
   0xf   : > { %p25_p12 = scmp.eq.s32.totalorder %s24_s28, 0  ;;  %p34_p13 = scmp.ne.s32.totalorder %s563_s14, %s559_s13 }
  0x10   : > { %p380_p11 = pnand %p379_p10, %p41_p1  ;;  %p35_p0 = scmp.eq.s32.totalorder %s567_s15, 0 }
  0x11   : > { %s653_s29 = scalar_select %p25_p12, %s563_s14, %s27_s27  }
  0x12   : > { %382 = dma.hbm_to_vmem [thread:$0]  (!%p380_p11), %s132_s22, 16, %s134_s25, [#allocation6]  }
  0x13   : > { %p657_p3 = por %p106_p2, %p34_p13  ;;  %p392_p5 = scmp.lt.s32.totalorder %s567_s15, 2 }
  0x14   : > { %s147_s4 = sand.u32 1, %s563_s14   ;;  %s362_s5 = sshll.u32 %s567_s15, 3 }
  0x15   : > { %p36_p7 = por %p35_p0, %p34_p13  ;;  %s361_s6 = sshll.u32 %s147_s4, 3 }
  0x16   : > { %s155_s9 = scalar_lea.hbm %s739_s0, %s362_s5  ;;  %s151_s11 = scalar_lea.vmem [#allocation2], %s361_s6 }
  0x17   : > { %s157_s10 = sshll.u32 %s155_s9, 4  ;;  %s159_s17 = sshll.u32 %s151_s11, 4  ;;  %s158_s10 = int_to_ptr.hbm [resolvable:$true] %s157_s10  ;;  %s160_s17 = int_to_ptr.vmem [resolvable:$true] %s159_s17 }
  0x18   : > { %p667_p10 = pnand %p392_p5, %p36_p7  ;;  %s148_s21 = scalar_lea.sflag [#allocation3], %s147_s4 }
  0x19   : > { %s467_s22 = sshra.s32 %s158_s10, 4  ;;  %s474_s28 = scalar_lea.hbm %s739_s0, 16  ;;  %s468_s22 = int_to_ptr.hbm [resolvable:$true] %s467_s22 }
  0x1a   : > { %s469_s24 = scalar_lea.hbm %s468_s22, 8  ;;  %p471_p11 = pneg %p667_p10 }
  0x1b   : > { %p470_p2 = scmp.ne.s32.totalorder %s468_s22, %s469_s24  ;;  %p475_p0 = scmp.lt.s32.totalorder %s468_s22, %s739_s0 }
  0x1c   : > { %p476_p5 = scmp.lt.s32.totalorder %s474_s28, %s469_s24 }
  0x1d   : > { %p472_p12 = pnand %p471_p11, %p470_p2 }
  0x1e   : > { %p477_p7 = por %p476_p5, %p475_p0 }
  0x1f   : > { %p473_p13 = pneg %p472_p12 }
  0x21   : > { %p478_p9 = pnand %p477_p7, %p473_p13 }
  0x23   : > { %481 = shalt.err (!%p478_p9)
}
  0x24   : > { %386 = dma.hbm_to_vmem [thread:$0]  (!%p667_p10), %s158_s10, 128, %s160_s17, %s148_s21  }
  0x25   : > { %168 = sbr.rel (%p634_p8) target bundleno = 337 (0x151), region = 32  ;;  %s684_s4 = sand.u32 (!%p634_p8), 1, %s559_s13  }
  0x26   : > { %s364_s7 = sshll.u32 (!%p634_p8), %s684_s4, 3  ;;  %s171_s8 = scalar_lea.sflag (!%p634_p8), [#allocation3], %s684_s4 }
  0x27   : > { %s174_s9 = scalar_lea.vmem (!%p634_p8), [#allocation2], %s364_s7 }
  0x2a   : > { %542 = dma.done.wait (%p621_p4), %s171_s8, 128  }
  0x2b   : > { %544 = vsyncadd (%p621_p4), %s171_s8, 4294967168 }
  0x2c   : > { %546 = dma.done.wait (%p41_p1), [#allocation6], 16  }
  0x2d   : > { %548 = vsyncadd (%p41_p1), [#allocation6], 4294967280  ;;  %vm204_vm0 = vcmask 261120   ;;  %v203_v0 = vld [vmem:[%s174_s9] sm:$0xff]  ;;  %v570_v2 = vmov 32.0   ;;  %s368_s18 = sshll.u32 %s612_s16, 3 }
  0x2e   : > { %v205_v1 = vsel %vm204_vm0, %v203_v0, 0.0  ;;  %431 = vrcp.f32 %v570_v2  ;;  %v429_v36 = vld [vmem:[#allocation5] ss:$0 sm:$0xff]  ;;  %s272_s11 = scalar_lea.hbm %s742_s3, %s368_s18  ;;  %v430_v39 = vld [vmem:[%s741_s2] ss:$0 sm:$0xff]  ;;  %s202_s16 = scalar_lea.vmem [#allocation7], %s364_s7 }
  0x2f   : > { %206 = vadd.xlane.f32.xlu0 %v205_v1  ;;  %s274_s21 = sshll.u32 %s202_s16, 4  ;;  %s276_s22 = sshll.u32 %s272_s11, 4  ;;  %s275_s21 = int_to_ptr.vmem [resolvable:$true] %s274_s21  ;;  %s277_s22 = int_to_ptr.hbm [resolvable:$true] %s276_s22 }
  0x30   : > { %s262_s24 = scalar_lea.sflag [#allocation4], %s684_s4  ;;  %s511_s25 = sshra.s32 %s277_s22, 4  ;;  %s512_s25 = int_to_ptr.hbm [resolvable:$true] %s511_s25 }
  0x31   : > { %s513_s27 = scalar_lea.hbm %s512_s25, 8  ;;  %s517_s6 = scalar_lea.hbm %s742_s3, 16 }
  0x32   : > { %p514_p1 = scmp.ne.s32.totalorder %s512_s25, %s513_s27  ;;  %p518_p9 = scmp.lt.s32.totalorder %s512_s25, %s742_s3 }
  0x33   : > { %p519_p10 = scmp.lt.s32.totalorder %s517_s6, %s513_s27 }
  0x34   : > { %v432_v3 = vpop.eup %431  ;;  %p515_p4 = pnand %p514_p1, %p657_p3 }
  0x35   : > { %v209_v4 = vmul.f32 32.0, %v432_v3  ;;  %vm213_vm1 = vweird.f32 %v432_v3  ;;  %p520_p2 = por %p519_p10, %p518_p9 }
  0x36   : > { %p516_p8 = pneg %p515_p4 }
  0x37   : > { %v210_v5 = vsub.f32 1.0, %v209_v4 }
  0x38   : > { %p521_p11 = pnand %p520_p2, %p516_p8 }
  0x39   : > { %v211_v6 = vmul.f32 %v432_v3, %v210_v5 }
  0x3b   : > { %v212_v7 = vadd.f32 %v432_v3, %v211_v6 }
  0x3d   : > { %v214_v8 = vsel %vm213_vm1, %v432_v3, %v212_v7 }
  0xa2   : > { %v207_v9 = vpop.xlane.xlu0 %206 }
  0xa3   : > { %v215_v10 = vmul.f32 %v214_v8, %v207_v9 }
  0xa5   : > { %v216_v11 = vsub.f32 %v203_v0, %v215_v10 }
  0xa7   : > { %v217_v12 = vmul.f32 %v216_v11, %v216_v11 }
  0xa9   : > { %v218_v13 = vsel %vm204_vm0, %v217_v12, 0.0 }
  0xaa   : > { %219 = vadd.xlane.f32.xlu0 %v218_v13 }
 0x11d   : > { %v220_v14 = vpop.xlane.xlu0 %219 }
 0x11e   : > { %v221_v15 = vmul.f32 0.032258064, %v220_v14 }
 0x120   : > { %433 = vrsqrt.f32 %v221_v15  ;;  %vm229_vm2 = vcmp.eq.f32.partialorder %v221_v15, inf  ;;  %v232_v23 = vand.u32 2147483648, %v221_v15  ;;  %vm231_vm3 = vcmp.eq.f32.partialorder %v221_v15, 0.0 }
 0x126   : > { %v434_v16 = vpop.eup %433 }
 0x127   : > { %v223_v17 = vmul.f32 %v434_v16, %v221_v15 }
 0x129   : > { %v224_v18 = vmul.f32 %v434_v16, %v223_v17 }
 0x12b   : > { %v225_v19 = vmul.f32 0.5, %v224_v18 }
 0x12d   : > { %v226_v20 = vsub.f32 1.5, %v225_v19 }
 0x12f   : > { %v227_v21 = vmul.f32 %v434_v16, %v226_v20 }
 0x131   : > { %v228_v22 = vmul.f32 %v227_v21, %v221_v15 }
 0x133   : > { %v230_v24 = vsel %vm229_vm2, %v221_v15, %v228_v22 }
 0x134   : > { %v233_v25 = vsel %vm231_vm3, %v232_v23, %v230_v24 }
 0x135   : > { %v234_v26 = vadd.f32 1e-06, %v233_v25 }
 0x137   : > { %435 = vrcp.f32 %v234_v26  ;;  %v246_v30 = vand.u32 2147483648, %v234_v26  ;;  %v244_v32 = vand.u32 2147483647, %v234_v26  ;;  %vm240_vm5 = vweird.f32 %v234_v26 }
 0x139   : > { %v247_v34 = vor.u32 1.1754944e-38, %v246_v30  ;;  %vm245_vm7 = vcmp.eq.f32.partialorder %v244_v32, 8.507059e+37 }
 0x13d   : > { %v436_v27 = vpop.eup %435 }
 0x13e   : > { %v236_v28 = vmul.f32 %v436_v27, %v234_v26  ;;  %vm241_vm4 = vweird.f32 %v436_v27 }
 0x13f   : > { %vm242_vm6 = vmor %vm240_vm5, %vm241_vm4 }
 0x140   : > { %v237_v29 = vsub.f32 1.0, %v236_v28 }
 0x142   : > { %v238_v31 = vmul.f32 %v436_v27, %v237_v29 }
 0x144   : > { %v239_v33 = vadd.f32 %v436_v27, %v238_v31 }
 0x146   : > { %v243_v35 = vsel %vm242_vm6, %v436_v27, %v239_v33 }
 0x147   : > { %v248_v37 = vsel %vm245_vm7, %v247_v34, %v243_v35 }
 0x148   : > { %v249_v38 = vmul.f32 %v248_v37, %v216_v11 }
 0x14a   : > { %v254_v40 = vmul.f32 %v429_v36, %v249_v38 }
 0x14c   : > { %v259_v41 = vadd.f32 %v430_v39, %v254_v40 }
 0x14e   : > { %260 = vst.msk [vmem:[%s202_s16] sm:$0xff] %vm204_vm0, %v259_v41 }
 0x14f   : > { %524 = shalt.err (!%p521_p11)
}
 0x150   : > { %377 = dma.vmem_to_hbm [thread:$0]  (%p657_p3), %s275_s21, 128, %s277_s22, %s262_s24  }
 0x151 PF: > { %s288_s4 = sand.u32 1, %s555_s12   ;;  %p748_p12 = scmp.ge.s32.totalorder %s567_s15, 2 }
 0x152   : > { %s289_s9 = scalar_lea.sflag [#allocation4], %s288_s4 }
 0x153   : > { %p388_p13 = pnand %p748_p12, %p626_p6 }
 0x155   : > { %p389_p0 = pneg %p388_p13 }
 0x157   : > { %550 = dma.done.wait (%p389_p0), %s289_s9, 128  }
 0x158   : > { %552 = vsyncadd (%p389_p0), %s289_s9, 4294967168  ;;  %p17_p5 = scmp.ge.s32.totalorder %s644_s26, 4   ;;  %s749_s12 = smov %s559_s13 }
 0x159   : > { %s750_s13 = smov %s563_s14  ;;  %s751_s14 = smov %s653_s29 }
 0x15a   : > { %s752_s15 = smov %s644_s26  ;;  %19 = sbr.rel (!%p17_p5) target bundleno = 6 (0x6), region = 81 }
 0x15f   :  { %295 = vsyncpa [#allocation3], 1 }
 0x160   :  { %297 = vsyncpa [#allocation3 + $0x1], 1 }
 0x161   :  { %298 = vsyncpa [#allocation6], 1 }
 0x162   :  { %299 = vsyncpa [#allocation4], 1 }
 0x163   :  { %301 = vsyncpa [#allocation4 + $0x1], 1 }

</bundles_post_ra>
